<compile_context>
chip_gen: v7x
topology: tpu7x:2x2x1
jax: 0.10.0
libtpu: 0.0.40
codegen_flags: <defaults>
</compile_context>

<pallas_src>
import functools

import jax
import jax.numpy as jnp
from jax.experimental import pallas as pl
from jax.experimental.pallas import tpu as pltpu


# --------------------------------------------------------------------------
# kernels
# --------------------------------------------------------------------------
def _proj_kernel(x_ref, w1_ref, b1_ref, wqkv_ref, bqkv_ref, o_ref):
    # y1 = ReLU(x @ (W1^T * bn1_scale) + bn1_shift)     (BN1 folded)
    y1 = jnp.maximum(
        jnp.dot(x_ref[...], w1_ref[...], preferred_element_type=jnp.float32)
        + b1_ref[...], 0.0)
    # [q | k | v] in one lane-dense matmul
    o_ref[...] = (jnp.dot(y1, wqkv_ref[...], preferred_element_type=jnp.float32)
                  + bqkv_ref[...])


def _attn_kernel(q_ref, kg_ref, vg_ref, pr_ref, xid_ref,
                 wp1_ref, bp1_ref, wp2_ref, bp2_ref,
                 sw1_ref, tw1_ref, ww1_ref, bw1_ref,
                 ww2_ref, bw2_ref, s2_ref, t2_ref,
                 w3_ref, t3_ref, o_ref,
                 *, tm, ns, c, cs, s):
    tmns = tm * ns
    q = q_ref[...]                                   # (tm, c)
    kg = kg_ref[...]                                 # (tm, ns, c)
    vg = vg_ref[...]                                 # (tm, ns, c)
    prel = pr_ref[...]                               # (tm, ns, 3)

    # positional MLP: Linear(3,3)+BN(3)(folded)+ReLU, then Linear(3,c).
    # contraction dim is 3 -> unrolled broadcast-multiplies (VPU) not MXU.
    wp1 = wp1_ref[...]                               # (3, 3)
    ph = (bp1_ref[...]
          + prel[:, :, 0:1] * wp1[0, :]
          + prel[:, :, 1:2] * wp1[1, :]
          + prel[:, :, 2:3] * wp1[2, :])
    ph = jnp.maximum(ph, 0.0)                        # (tm, ns, 3)
    wp2 = wp2_ref[...]                               # (3, c)
    p_r = (bp2_ref[...]
           + ph[:, :, 0:1] * wp2[0, :]
           + ph[:, :, 1:2] * wp2[1, :]
           + ph[:, :, 2:3] * wp2[2, :])              # (tm, ns, c)

    # vector-attention weights
    w = kg - q[:, None, :] + p_r                     # (tm, ns, c)
    w = jnp.maximum(w * sw1_ref[...] + tw1_ref[...], 0.0)   # BN_w1 + ReLU
    wf = w.reshape(tmns, c)
    wf = jnp.maximum(
        jnp.dot(wf, ww1_ref[...], preferred_element_type=jnp.float32)
        + bw1_ref[...], 0.0)                         # Linear_w1 + BN_w2(folded) + ReLU
    wf = (jnp.dot(wf, ww2_ref[...], preferred_element_type=jnp.float32)
          + bw2_ref[...])                            # Linear_w2 -> (tm*ns, cs)

    # softmax over the neighbour axis
    wsm = wf.reshape(tm, ns, cs)
    wsm = wsm - jnp.max(wsm, axis=1, keepdims=True)
    wsm = jnp.exp(wsm)
    wsm = wsm / jnp.sum(wsm, axis=1, keepdims=True)

    # shared-planes aggregation: output channel ch uses weight ch % cs
    wfull = jnp.concatenate([wsm] * s, axis=-1)      # (tm, ns, c)
    attn = jnp.sum((vg + p_r) * wfull, axis=1)       # (tm, c)

    # BN2 + ReLU, then Linear3 + BN3 (folded) + residual + ReLU
    attn = jnp.maximum(attn * s2_ref[...] + t2_ref[...], 0.0)
    y = (jnp.dot(attn, w3_ref[...], preferred_element_type=jnp.float32)
         + t3_ref[...])
    o_ref[...] = jnp.maximum(y + xid_ref[...], 0.0)


# --------------------------------------------------------------------------
# wrapper
# --------------------------------------------------------------------------
def _rep_spec(shape):
    nd = len(shape)
    return pl.BlockSpec(shape, lambda *args, nd=nd: (0,) * nd)


def _pad_rows(a, n_pad):
    pad = n_pad - a.shape[0]
    if pad == 0:
        return a
    return jnp.concatenate([a, jnp.zeros((pad,) + a.shape[1:], a.dtype)], axis=0)


def _bn_fold(gamma, beta, rmean, rvar, eps):
    scale = gamma / jnp.sqrt(rvar + eps)
    shift = beta - rmean * scale
    return scale, shift


def knn_segments(p, o, nsample):
    """pointops.knnquery equivalent: nsample nearest points within each segment."""
    # TODO(synk): data-dependent segmented kNN sort has no clean Pallas
    # equivalent; done as masked top-k in plain JAX glue.
    n = p.shape[0]
    seg_id = jnp.searchsorted(o, jnp.arange(n, dtype=jnp.int32), side='right')
    diff = p[:, None, :] - p[None, :, :]
    d2 = jnp.sum(diff * diff, axis=-1)
    same = seg_id[:, None] == seg_id[None, :]
    d2 = jnp.where(same, d2, jnp.inf)
    _, idx = jax.lax.top_k(-d2, nsample)
    return idx


def bottleneck_forward(p, x, o, params, *, nsample=8, tm=8):
    """p: (N,3) coords, x: (N,C) features, o: (B,) cumulative offsets."""
    n, c_in = x.shape
    prm = params
    c = prm['W1'].shape[0]
    s = prm['share_planes']
    cs = c // s
    eps = prm['eps']
    assert c_in == c, "residual requires in_planes == planes"
    assert int(o[-1]) == n, "offsets must cover all points (o[-1] == N)"

    # ---- fold BatchNorms into adjacent linears (done once, wrapper side) ----
    s1, t1 = _bn_fold(prm['bn1_g'], prm['bn1_b'], prm['bn1_rm'], prm['bn1_rv'], eps)
    w1f = prm['W1'].T * s1[None, :]                       # (c, c); linear1 has no bias
    b1f = t1.reshape(1, c)

    wqkv = jnp.concatenate([prm['Wq'].T, prm['Wk'].T, prm['Wv'].T], axis=1)  # (c, 3c)
    bqkv = jnp.concatenate([prm['bq'], prm['bk'], prm['bv']]).reshape(1, 3 * c)

    sp, tp = _bn_fold(prm['bnp_g'], prm['bnp_b'], prm['bnp_rm'], prm['bnp_rv'], eps)
    wp1f = prm['Wp1'].T * sp[None, :]                     # (3, 3)
    bp1f = (prm['bp1'] * sp + tp).reshape(1, 1, 3)
    wp2t = prm['Wp2'].T                                   # (3, c)
    bp2v = prm['bp2'].reshape(1, 1, c)

    sw1, tw1 = _bn_fold(prm['bnw1_g'], prm['bnw1_b'], prm['bnw1_rm'], prm['bnw1_rv'], eps)
    sw1 = sw1.reshape(1, 1, c)
    tw1 = tw1.reshape(1, 1, c)
    sw2, tw2 = _bn_fold(prm['bnw2_g'], prm['bnw2_b'], prm['bnw2_rm'], prm['bnw2_rv'], eps)
    ww1f = prm['Ww1'].T * sw2[None, :]                    # (c, cs)
    bw1f = (prm['bw1'] * sw2 + tw2).reshape(1, cs)
    ww2t = prm['Ww2'].T                                   # (cs, cs)
    bw2v = prm['bw2'].reshape(1, cs)

    s2, t2 = _bn_fold(prm['bn2_g'], prm['bn2_b'], prm['bn2_rm'], prm['bn2_rv'], eps)
    s2 = s2.reshape(1, c)
    t2 = t2.reshape(1, c)
    s3, t3 = _bn_fold(prm['bn3_g'], prm['bn3_b'], prm['bn3_rm'], prm['bn3_rv'], eps)
    w3f = prm['W3'].T * s3[None, :]                       # (c, c); linear3 has no bias
    t3 = t3.reshape(1, c)

    n_pad = ((n + tm - 1) // tm) * tm
    grid = (n_pad // tm,)
    cp = pltpu.CompilerParams(dimension_semantics=("parallel",))

    # ---- pass 1: Linear1+BN1+ReLU fused with the q/k/v projection ----
    qkv = pl.pallas_call(
        _proj_kernel,
        out_shape=jax.ShapeDtypeStruct((n_pad, 3 * c), jnp.float32),
        grid=grid,
        in_specs=[
            pl.BlockSpec((tm, c), lambda i: (i, 0)),
            _rep_spec((c, c)),
            _rep_spec((1, c)),
            _rep_spec((c, 3 * c)),
            _rep_spec((1, 3 * c)),
        ],
        out_specs=pl.BlockSpec((tm, 3 * c), lambda i: (i, 0)),
        compiler_params=cp,
    )(_pad_rows(x, n_pad), w1f, b1f, wqkv, bqkv)
    q = qkv[:n, :c]
    k = qkv[:n, c:2 * c]
    v = qkv[:n, 2 * c:]

    # ---- glue: segment-restricted kNN + gathers (pointops.queryandgroup) ----
    idx = knn_segments(p, o, nsample)                     # (n, nsample)
    kg = k[idx]                                           # (n, nsample, c)
    vg = v[idx]                                           # (n, nsample, c)
    prel = p[idx] - p[:, None, :]                         # (n, nsample, 3)

    # ---- pass 2: fused positional MLP + vector attention + epilogue ----
    kernel = functools.partial(_attn_kernel, tm=tm, ns=nsample, c=c, cs=cs, s=s)
    out = pl.pallas_call(
        kernel,
        out_shape=jax.ShapeDtypeStruct((n_pad, c), jnp.float32),
        grid=grid,
        in_specs=[
            pl.BlockSpec((tm, c), lambda i: (i, 0)),               # q
            pl.BlockSpec((tm, nsample, c), lambda i: (i, 0, 0)),   # k grouped
            pl.BlockSpec((tm, nsample, c), lambda i: (i, 0, 0)),   # v grouped
            pl.BlockSpec((tm, nsample, 3), lambda i: (i, 0, 0)),   # relative coords
            pl.BlockSpec((tm, c), lambda i: (i, 0)),               # identity (x)
            _rep_spec((3, 3)), _rep_spec((1, 1, 3)),
            _rep_spec((3, c)), _rep_spec((1, 1, c)),
            _rep_spec((1, 1, c)), _rep_spec((1, 1, c)),
            _rep_spec((c, cs)), _rep_spec((1, cs)),
            _rep_spec((cs, cs)), _rep_spec((1, cs)),
            _rep_spec((1, c)), _rep_spec((1, c)),
            _rep_spec((c, c)), _rep_spec((1, c)),
        ],
        out_specs=pl.BlockSpec((tm, c), lambda i: (i, 0)),
        compiler_params=cp,
    )(_pad_rows(q, n_pad), _pad_rows(kg, n_pad), _pad_rows(vg, n_pad),
      _pad_rows(prel, n_pad), _pad_rows(x, n_pad),
      wp1f, bp1f, wp2t, bp2v, sw1, tw1, ww1f, bw1f, ww2t, bw2v,
      s2, t2, w3f, t3)
    return out[:n]


# --------------------------------------------------------------------------
# plain-JAX reference (mirrors the PyTorch forward, layer by layer, unfused)
# --------------------------------------------------------------------------
def _bn_eval(z, g, b, rm, rv, eps):
    return (z - rm) / jnp.sqrt(rv + eps) * g + b


def bottleneck_reference(p, x, o, idx, prm):
    eps = prm['eps']
    s = prm['share_planes']
    y1 = jax.nn.relu(_bn_eval(x @ prm['W1'].T, prm['bn1_g'], prm['bn1_b'],
                              prm['bn1_rm'], prm['bn1_rv'], eps))
    q = y1 @ prm['Wq'].T + prm['bq']
    k = y1 @ prm['Wk'].T + prm['bk']
    v = y1 @ prm['Wv'].T + prm['bv']
    kg, vg = k[idx], v[idx]
    prel = p[idx] - p[:, None, :]
    ph = jax.nn.relu(_bn_eval(prel @ prm['Wp1'].T + prm['bp1'],
                              prm['bnp_g'], prm['bnp_b'],
                              prm['bnp_rm'], prm['bnp_rv'], eps))
    p_r = ph @ prm['Wp2'].T + prm['bp2']
    w = kg - q[:, None, :] + p_r        # out_planes // mid_planes == 1
    w = jax.nn.relu(_bn_eval(w, prm['bnw1_g'], prm['bnw1_b'],
                             prm['bnw1_rm'], prm['bnw1_rv'], eps))
    w = w @ prm['Ww1'].T + prm['bw1']
    w = jax.nn.relu(_bn_eval(w, prm['bnw2_g'], prm['bnw2_b'],
                             prm['bnw2_rm'], prm['bnw2_rv'], eps))
    w = w @ prm['Ww2'].T + prm['bw2']
    w = jax.nn.softmax(w, axis=1)
    n, ns, c = vg.shape
    a = (vg + p_r).reshape(n, ns, s, c // s)
    attn = (a * w[:, :, None, :]).sum(axis=1).reshape(n, c)
    y = jax.nn.relu(_bn_eval(attn, prm['bn2_g'], prm['bn2_b'],
                             prm['bn2_rm'], prm['bn2_rv'], eps))
    y = _bn_eval(y @ prm['W3'].T, prm['bn3_g'], prm['bn3_b'],
                 prm['bn3_rm'], prm['bn3_rv'], eps)
    return jax.nn.relu(y + x)


if __name__ == "__main__":
    planes = 64              # in_planes == planes (residual connection)
    share_planes = 8
    nsample = 8              # <= smallest segment size
    N = 24
    o = jnp.array([16, 24], dtype=jnp.int32)   # cumulative batch offsets (B=2)

    key = jax.random.PRNGKey(0)
    kit = iter(jax.random.split(key, 64))

    def nrm(shape, scale=0.1):
        return scale * jax.random.normal(next(kit), shape, dtype=jnp.float32)

    def bn(ch):
        return dict(
            g=1.0 + 0.1 * jax.random.normal(next(kit), (ch,), jnp.float32),
            b=nrm((ch,)),
            rm=nrm((ch,)),
            rv=0.5 + jax.random.uniform(next(kit), (ch,), dtype=jnp.float32),
        )

    p = jax.random.normal(next(kit), (N, 3), dtype=jnp.float32)
    x = jax.random.normal(next(kit), (N, planes), dtype=jnp.float32)

    c = planes
    cs = c // share_planes
    bn1, bnp, bnw1, bnw2, bn2, bn3 = bn(c), bn(3), bn(c), bn(cs), bn(c), bn(c)

    params = {
        'share_planes': share_planes, 'eps': 1e-5,
        # linear1 (no bias) + bn1
        'W1': nrm((c, c)),
        'bn1_g': bn1['g'], 'bn1_b': bn1['b'], 'bn1_rm': bn1['rm'], 'bn1_rv': bn1['rv'],
        # q / k / v projections
        'Wq': nrm((c, c)), 'bq': nrm((c,)),
        'Wk': nrm((c, c)), 'bk': nrm((c,)),
        'Wv': nrm((c, c)), 'bv': nrm((c,)),
        # linear_p: Linear(3,3) + BN(3) + ReLU + Linear(3,c)
        'Wp1': nrm((3, 3)), 'bp1': nrm((3,)),
        'bnp_g': bnp['g'], 'bnp_b': bnp['b'], 'bnp_rm': bnp['rm'], 'bnp_rv': bnp['rv'],
        'Wp2': nrm((c, 3)), 'bp2': nrm((c,)),
        # linear_w: BN(c)+ReLU+Linear(c,cs)+BN(cs)+ReLU+Linear(cs,cs)
        'bnw1_g': bnw1['g'], 'bnw1_b': bnw1['b'],
        'bnw1_rm': bnw1['rm'], 'bnw1_rv': bnw1['rv'],
        'Ww1': nrm((cs, c)), 'bw1': nrm((cs,)),
        'bnw2_g': bnw2['g'], 'bnw2_b': bnw2['b'],
        'bnw2_rm': bnw2['rm'], 'bnw2_rv': bnw2['rv'],
        'Ww2': nrm((cs, cs)), 'bw2': nrm((cs,)),
        # bn2
        'bn2_g': bn2['g'], 'bn2_b': bn2['b'], 'bn2_rm': bn2['rm'], 'bn2_rv': bn2['rv'],
        # linear3 (no bias) + bn3
        'W3': nrm((c, c)),
        'bn3_g': bn3['g'], 'bn3_b': bn3['b'], 'bn3_rm': bn3['rm'], 'bn3_rv': bn3['rv'],
    }

    out = bottleneck_forward(p, x, o, params, nsample=nsample, tm=8)
    out = jax.block_until_ready(out)

    idx = knn_segments(p, o, nsample)
    ref = bottleneck_reference(p, x, o, idx, params)
    err = float(jnp.max(jnp.abs(out - ref)))
    assert out.shape == (N, planes), out.shape
    assert err < 2e-4, err

    print("KERNEL_OK")
</pallas_src>

<mosaic_0001>
module attributes {stable_mosaic.version = 11 : i64} {
  func.func @_proj_kernel(%arg0: i32, %arg1: memref<8x64xf32, #tpu.memory_space<vmem>>, %arg2: memref<64x64xf32, #tpu.memory_space<vmem>>, %arg3: memref<1x64xf32, #tpu.memory_space<vmem>>, %arg4: memref<64x192xf32, #tpu.memory_space<vmem>>, %arg5: memref<1x192xf32, #tpu.memory_space<vmem>>, %arg6: memref<8x192xf32, #tpu.memory_space<vmem>>) attributes {dimension_semantics = [#tpu.dimension_semantics<parallel>], iteration_bounds = array<i64: 3>, scalar_prefetch = 0 : i64, scratch_operands = 0 : i64, tpu.core_type = #tpu.core_type<tc>, window_params = [{transform_indices = @transform_0, window_bounds = array<i64: 8, 64>}, {pipeline_mode = #tpu.pipeline_mode<synchronous>, transform_indices = @transform_1, window_bounds = array<i64: 64, 64>}, {pipeline_mode = #tpu.pipeline_mode<synchronous>, transform_indices = @transform_2, window_bounds = array<i64: 1, 64>}, {pipeline_mode = #tpu.pipeline_mode<synchronous>, transform_indices = @transform_3, window_bounds = array<i64: 64, 192>}, {pipeline_mode = #tpu.pipeline_mode<synchronous>, transform_indices = @transform_4, window_bounds = array<i64: 1, 192>}, {transform_indices = @transform_5, window_bounds = array<i64: 8, 192>}]} {
    %c0 = arith.constant 0 : index
    %c0_0 = arith.constant 0 : index
    %0 = vector.load %arg1[%c0, %c0_0] : memref<8x64xf32, #tpu.memory_space<vmem>>, vector<8x64xf32>
    %c0_1 = arith.constant 0 : index
    %c0_2 = arith.constant 0 : index
    %1 = vector.load %arg2[%c0_1, %c0_2] : memref<64x64xf32, #tpu.memory_space<vmem>>, vector<64x64xf32>
    %cst = arith.constant dense<0.000000e+00> : vector<8x64xf32>
    %2 = tpu.matmul %0, %1, %cst {dimension_numbers = #tpu.dot_dimension_numbers<[1], [0], [0], [1], [0, 0, 1, 1], [], []>} : vector<8x64xf32>, vector<64x64xf32>, vector<8x64xf32> -> vector<8x64xf32>
    %c0_3 = arith.constant 0 : index
    %c0_4 = arith.constant 0 : index
    %3 = vector.load %arg3[%c0_3, %c0_4] : memref<1x64xf32, #tpu.memory_space<vmem>>, vector<1x64xf32>
    %4 = vector.broadcast %3 : vector<1x64xf32> to vector<8x64xf32>
    %5 = arith.addf %2, %4 : vector<8x64xf32>
    %cst_5 = arith.constant 0.000000e+00 : f32
    %6 = vector.broadcast %cst_5 : f32 to vector<8x64xf32>
    %7 = arith.maximumf %5, %6 : vector<8x64xf32>
    %c0_6 = arith.constant 0 : index
    %c0_7 = arith.constant 0 : index
    %8 = vector.load %arg4[%c0_6, %c0_7] : memref<64x192xf32, #tpu.memory_space<vmem>>, vector<64x192xf32>
    %cst_8 = arith.constant dense<0.000000e+00> : vector<8x192xf32>
    %9 = tpu.matmul %7, %8, %cst_8 {dimension_numbers = #tpu.dot_dimension_numbers<[1], [0], [0], [1], [0, 0, 1, 1], [], []>} : vector<8x64xf32>, vector<64x192xf32>, vector<8x192xf32> -> vector<8x192xf32>
    %c0_9 = arith.constant 0 : index
    %c0_10 = arith.constant 0 : index
    %10 = vector.load %arg5[%c0_9, %c0_10] : memref<1x192xf32, #tpu.memory_space<vmem>>, vector<1x192xf32>
    %11 = vector.broadcast %10 : vector<1x192xf32> to vector<8x192xf32>
    %12 = arith.addf %9, %11 : vector<8x192xf32>
    %c0_11 = arith.constant 0 : index
    %c0_12 = arith.constant 0 : index
    %13 = vector.load %arg6[%c0_11, %c0_12] : memref<8x192xf32, #tpu.memory_space<vmem>>, vector<8x192xf32>
    tpu.vector_store %arg6[%c0_11, %c0_12], %12 {strides = array<i32>} : memref<8x192xf32, #tpu.memory_space<vmem>>, vector<8x192xf32>,
    return
  }
  func.func @transform_0(%arg0: i32) -> (i32, i32) {
    %c0_i32 = arith.constant 0 : i32
    %c0_i32_0 = arith.constant 0 : i32
    return %arg0, %c0_i32 : i32, i32
  }
  func.func @transform_1(%arg0: i32) -> (i32, i32) {
    %c0_i32 = arith.constant 0 : i32
    %c0_i32_0 = arith.constant 0 : i32
    %c0_i32_1 = arith.constant 0 : i32
    return %c0_i32, %c0_i32_0 : i32, i32
  }
  func.func @transform_2(%arg0: i32) -> (i32, i32) {
    %c0_i32 = arith.constant 0 : i32
    %c0_i32_0 = arith.constant 0 : i32
    %c0_i32_1 = arith.constant 0 : i32
    return %c0_i32, %c0_i32_0 : i32, i32
  }
  func.func @transform_3(%arg0: i32) -> (i32, i32) {
    %c0_i32 = arith.constant 0 : i32
    %c0_i32_0 = arith.constant 0 : i32
    %c0_i32_1 = arith.constant 0 : i32
    return %c0_i32, %c0_i32_0 : i32, i32
  }
  func.func @transform_4(%arg0: i32) -> (i32, i32) {
    %c0_i32 = arith.constant 0 : i32
    %c0_i32_0 = arith.constant 0 : i32
    %c0_i32_1 = arith.constant 0 : i32
    return %c0_i32, %c0_i32_0 : i32, i32
  }
  func.func @transform_5(%arg0: i32) -> (i32, i32) {
    %c0_i32 = arith.constant 0 : i32
    %c0_i32_0 = arith.constant 0 : i32
    return %arg0, %c0_i32 : i32, i32
  }
}

</mosaic_0001>

<bundles_post_ra>
// kernel: tpu_custom_call.1
= control target key start
LH: loop header
LB: loop body
LE: loop exit
PB: predicated region body
PF: predicated region fallthrough
CT: control target
= control target key end

     0   :  { %10 = vsyncpa [#allocation3], 0  ;;  %s1151_s0 = inlined_call_operand.hbm [shape: f32[24,64], index: 0, kind: input, shape index: {}]   ;;  %s1152_s1 = inlined_call_operand.hbm [shape: f32[64,64], index: 1, kind: input, shape index: {}]   ;;  %s1153_s2 = inlined_call_operand.vmem [shape: f32[1,64], index: 2, kind: input, shape index: {}]   ;;  %s1154_s3 = inlined_call_operand.hbm [shape: f32[64,192], index: 3, kind: input, shape index: {}]   ;;  %s1155_s4 = inlined_call_operand.vmem [shape: f32[1,192], index: 4, kind: input, shape index: {}]   ;;  %s1156_s5 = inlined_call_operand.hbm [shape: f32[24,192], index: 5, kind: output, shape index: {}]  }
   0x1   :  { %12 = vsyncpa [#allocation3 + $0x1], 0 }
   0x2   :  { %13 = vsyncpa [#allocation6], 0 }
   0x3   :  { %14 = vsyncpa [#allocation4], 0 }
   0x4   :  { %16 = vsyncpa [#allocation4 + $0x1], 0  ;;  %s918_s18 = smov 0   ;;  %s920_s19 = smov 0  }
   0x5   :  { %s922_s20 = smov 0   ;;  %s924_s21 = smov 0  }
   0x6 LB: > { %s939_s22 = sadd.s32 4294967295, %s875_s21   ;;  %s568_s23 = sadd.s32 4294967294, %s875_s21   ;;  %s875_s21 = sphi %s924_s21, %s1175_s21   ;;  %s871_s20 = sphi %s922_s20, %s1174_s20   ;;  %s867_s19 = sphi %s920_s19, %s1173_s19   ;;  %s863_s18 = sphi %s918_s18, %s1172_s18  }
   0x7   : > { %p42_p0 = scmp.ne.s32.totalorder %s867_s19, %s863_s18  ;;  %p1157_p1 = scmp.eq.s32.totalorder %s939_s22, 0 }
   0x8   : > { %p156_p3 = scmp.eq.s32.totalorder %s568_s23, 2  ;;  %p569_p5 = scmp.ge.s32.totalorder %s875_s21, 1 }
   0x9   : > { %p948_p4 = por %p1157_p1, %p42_p0  ;;  %p163_p7 = scmp.lt.s32.totalorder %s875_s21, 4 }
   0xa   : > { %p953_p6 = por %p156_p3, %p42_p0  ;;  %s877_s27 = smov [#allocation5]  }
   0xb   : > { %s1160_s24 = scalar_select %p948_p4, 1, 0 }
   0xc   : > { %s1161_s25 = scalar_select %p953_p6, 1, 0 }
   0xd   : > { %p958_p8 = pnand %p569_p5, %p163_p7  ;;  %s175_s28 = sshll.u32 %s877_s27, 4  ;;  %s176_s28 = int_to_ptr.vmem [resolvable:$true] %s175_s28 }
   0xe   : > { %s878_s30 = smov [#allocation7]   ;;  %s719_s9 = scalar_lea.hbm %s1152_s1, 1024 }
   0xf   : > { %s1162_s26 = scalar_select %p958_p8, 1, 0 }
  0x10   : > { %p657_p9 = pneg %p958_p8  ;;  %s191_s6 = sshll.u32 %s878_s30, 4  ;;  %s970_s6 = int_to_ptr.vmem [resolvable:$true] %s191_s6 }
  0x11   : > { %p720_p11 = scmp.ne.s32.totalorder %s1152_s1, %s719_s9  ;;  %p726_p3 = scmp.lt.u32.totalorder %s719_s9, %s1152_s1 }
  0x12   : > { %p966_p10 = pnand %p657_p9, %p1157_p1 }
  0x14   : > { %p721_p12 = pneg %p966_p10 }
  0x16   : > { %p722_p13 = pnand %p721_p12, %p720_p11 }
  0x18   : > { %p723_p0 = pneg %p722_p13 }
  0x1a   : > { %p728_p5 = pnand %p726_p3, %p723_p0 }
  0x1c   : > { %731 = shalt.err (!%p728_p5)
}
  0x1d   : > { %s732_s14 = scalar_lea.vmem %s176_s28, 1024  ;;  %p740_p2 = scmp.lt.s32.totalorder %s176_s28, %s176_s28 }
  0x1e   : > { %p733_p7 = scmp.ne.s32.totalorder %s176_s28, %s732_s14  ;;  %p741_p6 = scmp.lt.s32.totalorder %s732_s14, %s732_s14 }
  0x20   : > { %p735_p9 = pnand %p733_p7, %p721_p12  ;;  %p742_p4 = por %p741_p6, %p740_p2 }
  0x22   : > { %p736_p1 = pneg %p735_p9 }
  0x24   : > { %p743_p8 = pnand %p742_p4, %p736_p1 }
  0x26   : > { %746 = shalt.err (!%p743_p8)
}
  0x27   : > { %s879_s15 = smov 128   ;;  %s880_s16 = smov 8  }
  0x28   : > { %660 = dma.hbm_to_vmem [thread:$0]  (!%p966_p10), %s1152_s1, 1024, %s176_s28, [#allocation6], %s879_s15, %s879_s15, %s880_s16  }
  0x29   : > { %s747_s7 = scalar_lea.hbm %s1154_s3, 2048 }
  0x2a   : > { %p748_p11 = scmp.ne.s32.totalorder %s1154_s3, %s747_s7  ;;  %p754_p4 = scmp.lt.u32.totalorder %s747_s7, %s1154_s3 }
  0x2c   : > { %p750_p1 = pnand %p748_p11, %p721_p12 }
  0x2e   : > { %p751_p2 = pneg %p750_p1 }
  0x30   : > { %p756_p6 = pnand %p754_p4, %p751_p2 }
  0x32   : > { %759 = shalt.err (!%p756_p6)
}
  0x33   : > { %s760_s28 = scalar_lea.vmem %s970_s6, 2048  ;;  %p768_p3 = scmp.lt.s32.totalorder %s970_s6, %s970_s6 }
  0x34   : > { %p761_p8 = scmp.ne.s32.totalorder %s970_s6, %s760_s28  ;;  %p769_p5 = scmp.lt.s32.totalorder %s760_s28, %s760_s28 }
  0x36   : > { %p763_p13 = pnand %p761_p8, %p721_p12  ;;  %p770_p7 = por %p769_p5, %p768_p3 }
  0x38   : > { %p764_p0 = pneg %p763_p13 }
  0x3a   : > { %p771_p9 = pnand %p770_p7, %p764_p0 }
  0x3c   : > { %774 = shalt.err (!%p771_p9)
}
  0x3d   : > { %s881_s12 = smov 256   ;;  %s882_s13 = smov 16  }
  0x3e   : > { %663 = dma.hbm_to_vmem [thread:$0]  (!%p966_p10), %s1154_s3, 2048, %s970_s6, [#allocation6], %s881_s12, %s881_s12, %s882_s13  }
  0x3f   : > { %s1020_s16 = sadd.s32 1, %s875_s21   ;;  %s29_s23 = sadd.s32 1, %s871_s20 }
  0x40   : > { %s26_s17 = ssub.s32 %s875_s21, %s1020_s16  ;;  %p36_p11 = scmp.ne.s32.totalorder %s871_s20, %s867_s19 }
  0x41   : > { %p27_p12 = scmp.eq.s32.totalorder %s26_s17, 0  ;;  %p37_p1 = scmp.eq.s32.totalorder %s875_s21, 0 }
  0x42   : > { %p1164_p4 = scmp.eq.s32.totalorder %s939_s22, 2  ;;  %p674_p8 = scmp.lt.s32.totalorder %s875_s21, 3 }
  0x43   : > { %s1029_s27 = scalar_select %p27_p12, %s871_s20, %s29_s23  }
  0x44   : > { %p38_p2 = por %p37_p1, %p36_p11  ;;  %p1033_p6 = por %p1164_p4, %p36_p11 }
  0x45   : > { %s208_s29 = sand.u32 1, %s871_s20   ;;  %s574_s6 = sshll.u32 %s875_s21, 7 }
  0x46   : > { %s573_s7 = sshll.u32 %s208_s29, 3  ;;  %s1043_s10 = scalar_lea.hbm %s1151_s0, %s574_s6 }
  0x47   : > { %s212_s11 = scalar_lea.vmem [#allocation2], %s573_s7  ;;  %p1047_p10 = pnand %p674_p8, %p38_p2 }
  0x48   : > { %s219_s28 = sshll.u32 %s212_s11, 4  ;;  %s209_s13 = scalar_lea.sflag [#allocation3], %s208_s29  ;;  %s1045_s28 = int_to_ptr.vmem [resolvable:$true] %s219_s28 }
  0x49   : > { %s775_s14 = scalar_lea.hbm %s1043_s10, 128  ;;  %p777_p0 = pneg %p1047_p10 }
  0x4a   : > { %p776_p13 = scmp.ne.s32.totalorder %s1043_s10, %s775_s14  ;;  %s780_s23 = scalar_lea.hbm %s1151_s0, 384 }
  0x4b   : > { %p781_p7 = scmp.lt.u32.totalorder %s1043_s10, %s1151_s0  ;;  %p782_p9 = scmp.lt.u32.totalorder %s780_s23, %s775_s14 }
  0x4c   : > { %p778_p3 = pnand %p777_p0, %p776_p13  ;;  %p784_p11 = scmp.lt.u32.totalorder %s775_s14, %s1043_s10 }
  0x4d   : > { %p783_p12 = por %p782_p9, %p781_p7 }
  0x4e   : > { %p779_p5 = pneg %p778_p3 }
  0x4f   : > { %p785_p1 = por %p784_p11, %p783_p12 }
  0x51   : > { %p786_p2 = pnand %p785_p1, %p779_p5 }
  0x53   : > { %789 = shalt.err (!%p786_p2)
}
  0x54   : > { %s790_s29 = scalar_lea.vmem %s1045_s28, 128  ;;  %s883_s8 = smov [#allocation2]  }
  0x55   : > { %p791_p4 = scmp.ne.s32.totalorder %s1045_s28, %s790_s29  ;;  %s795_s9 = sshll.u32 %s883_s8, 4  ;;  %s796_s9 = int_to_ptr.vmem [resolvable:$false] %s795_s9 }
  0x56   : > { %s797_s11 = scalar_lea.vmem %s796_s9, 256  ;;  %p798_p3 = scmp.lt.s32.totalorder %s1045_s28, %s796_s9 }
  0x57   : > { %p793_p8 = pnand %p791_p4, %p777_p0  ;;  %p799_p7 = scmp.lt.s32.totalorder %s797_s11, %s790_s29 }
  0x59   : > { %p794_p13 = pneg %p793_p8  ;;  %p800_p9 = por %p799_p7, %p798_p3 }
  0x5b   : > { %p801_p12 = pnand %p800_p9, %p794_p13 }
  0x5d   : > { %804 = shalt.err (!%p801_p12)
}
  0x5e   : > { %667 = dma.hbm_to_vmem [thread:$0]  (!%p1047_p10), %s1043_s10, 128, %s1045_s28, %s209_s13  }
  0x5f   : > { %p1167_p5 = scmp.ne.s32.totalorder %s1162_s26, 0 }
  0x60   : > { %s1079_s14 = sand.u32 (!%p1167_p5), 1, %s867_s19   ;;  %p1168_p0 = scmp.ne.s32.totalorder (!%p1167_p5), %s1160_s24, 0 }
  0x61   : > { %228 = sbr.rel (%p1167_p5) target bundleno = 571 (0x23b), region = 40  ;;  %s576_s15 = sshll.u32 (!%p1167_p5), %s1079_s14, 3 }
  0x62   : > { %s231_s17 = scalar_lea.sflag (!%p1167_p5), [#allocation3], %s1079_s14  ;;  %s1083_s23 = scalar_lea.vmem (!%p1167_p5), [#allocation2], %s576_s15 }
  0x68   : > { %850 = dma.done.wait (%p1168_p0), %s231_s17, 128  }
  0x69   : > { %852 = vsyncadd (%p1168_p0), %s231_s17, 4294967168  ;;  %p1169_p10 = scmp.eq.s32.totalorder %s939_s22, 0 }
  0x6b   : > { %854 = dma.done.wait (%p1169_p10), [#allocation6], 3072   ;;  %p1170_p11 = pmov %p1169_p10 }
  0x6c   : > { %v884_v0 = vmov 0.0|0.0   ;;  %vm885_vm0 = vmmov 0   ;;  %v886_v1 = vmov 0.0   ;;  %v270_v2 = vld [vmem:[#allocation5] sm:$0xff]  ;;  %v271_v3 = vld [vmem:[#allocation5 + $0x8] sm:$0xff]  ;;  %v272_v4 = vld [vmem:[#allocation5 + $0x10] sm:$0xff]  ;;  %v378_v44 = vlaneseq }
  0x6d   : > { %856 = vsyncadd (%p1170_p11), [#allocation6], 4294964224  ;;  %617 = vmatprep.subr.bf16.mxu0 %v884_v0  ;;  %614 = vmatprep.mubr.msk.f32.mxu0 %vm885_vm0, %v886_v1  ;;  %v618_v5 = vpack.c.bf16 %v271_v3, %v270_v2  ;;  %v273_v6 = vld [vmem:[#allocation5 + $0x18] sm:$0xff]  ;;  %v274_v7 = vld [vmem:[#allocation5 + $0x20] sm:$0xff]  ;;  %vm285_vm1 = vcmask 523264   ;;  %s579_s10 = sshll.u32 %s1079_s14, 4 }
  0x6e   : > { %455 = vmatprep.mubr.f32.mxu1 %v886_v1  ;;  %v275_v8 = vld [vmem:[#allocation5 + $0x28] sm:$0xff]  ;;  %v621_v9 = vpack.c.bf16 %v273_v6, %v272_v4  ;;  %v363_v11 = vld [vmem:[#allocation7 + $0x18] sm:$0xff]  ;;  %v360_v12 = vld [vmem:[#allocation7] sm:$0xff]  ;;  %v379_v45 = vshrl.u32 %v378_v44, 7  ;;  %s588_s13 = sshll.u32 %s939_s22, 8  ;;  %s268_s7 = scalar_lea.vmem [#allocation8], %s579_s10 }
  0x6f   : > { %619 = vmatpush3.bf16.msra.mxu0 %v618_v5  ;;  %v361_v10 = vld [vmem:[#allocation7 + $0x8] sm:$0xff]  ;;  %v362_v14 = vld [vmem:[#allocation7 + $0x10] sm:$0xff]  ;;  %v367_v16 = vld [vmem:[#allocation7 + $0x38] sm:$0xff]  ;;  %v624_v23 = vpack.c.bf16 %v275_v8, %v274_v7  ;;  %s479_s6 = sshll.u32 %s268_s7, 4  ;;  %s1107_s9 = scalar_lea.hbm %s1156_s5, %s588_s13  ;;  %s1109_s6 = int_to_ptr.vmem [resolvable:$true] %s479_s6 }
  0x70   : > { %620 = vmatprep.subr.bf16.mxu0 %v884_v0  ;;  %v629_v13 = vpack.c.bf16 %v363_v11, %v361_v10  ;;  %v365_v15 = vld [vmem:[#allocation7 + $0x28] sm:$0xff]  ;;  %v631_v17 = vpack.c.bf16 %v362_v14, %v360_v12  ;;  %v364_v19 = vld [vmem:[#allocation7 + $0x20] sm:$0xff]  ;;  %v366_v20 = vld [vmem:[#allocation7 + $0x30] sm:$0xff]  ;;  %v380_v46 = vsub.s32 0, %v379_v45  ;;  %v384_v48 = vsub.s32 1, %v379_v45  ;;  %s465_s22 = scalar_lea.sflag [#allocation4], %s1079_s14 }
  0x71   : > { %v633_v18 = vpack.c.bf16 %v367_v16, %v365_v15  ;;  %v369_v21 = vld [vmem:[#allocation7 + $0x48] sm:$0xff]  ;;  %v371_v22 = vld [vmem:[#allocation7 + $0x58] sm:$0xff]  ;;  %v276_v24 = vld [vmem:[#allocation5 + $0x30] sm:$0xff]  ;;  %v635_v25 = vpack.c.bf16 %v366_v20, %v364_v19  ;;  %s805_s11 = scalar_lea.vmem %s1109_s6, 256  ;;  %s887_s15 = smov [#allocation8]  }
  0x72   : > { %630 = vmatprep.subr.bf16.mxu1 %v629_v13  ;;  %v277_v26 = vld [vmem:[#allocation5 + $0x38] sm:$0xff]  ;;  %v637_v27 = vpack.c.bf16 %v371_v22, %v369_v21  ;;  %v368_v28 = vld [vmem:[#allocation7 + $0x40] sm:$0xff]  ;;  %v370_v29 = vld [vmem:[#allocation7 + $0x50] sm:$0xff]  ;;  %p806_p1 = scmp.ne.s32.totalorder %s1109_s6, %s805_s11  ;;  %s809_s17 = sshll.u32 %s887_s15, 4  ;;  %s810_s17 = int_to_ptr.vmem [resolvable:$false] %s809_s17 }
  0x73   : > { %622 = vmatpush3.bf16.msra.mxu0 %v621_v9  ;;  %632 = vmatpush1.bf16.msra.mxu1 %v631_v17  ;;  %v627_v30 = vpack.c.bf16 %v277_v26, %v276_v24  ;;  %v639_v31 = vpack.c.bf16 %v370_v29, %v368_v28  ;;  %v269_v32 = vld [vmem:[%s1083_s23] sm:$0xff]  ;;  %v373_v33 = vld [vmem:[#allocation7 + $0x68] sm:$0xff]  ;;  %v372_v36 = vld [vmem:[#allocation7 + $0x60] sm:$0xff]  ;;  %s811_s23 = scalar_lea.vmem %s810_s17, 512  ;;  %p812_p8 = scmp.lt.s32.totalorder %s1109_s6, %s810_s17 }
  0x74   : > { %623 = vmatprep.subr.bf16.mxu0 %v884_v0  ;;  %634 = vmatprep.subr.bf16.mxu1 %v633_v18  ;;  %v375_v34 = vld [vmem:[#allocation7 + $0x78] sm:$0xff]  ;;  %v374_v37 = vld [vmem:[#allocation7 + $0x70] sm:$0xff]  ;;  %p807_p2 = pnand %p806_p1, %p1033_p6  ;;  %p813_p13 = scmp.lt.s32.totalorder %s811_s23, %s805_s11 }
  0x75   : > { %v641_v35 = vpack.c.bf16 %v375_v34, %v373_v33  ;;  %v643_v38 = vpack.c.bf16 %v374_v37, %v372_v36  ;;  %v580_v39 = vld [vmem:[%s1153_s2] ss:$0 sm:$0xff] }
  0x76   : > { %v376_v47 = vld [vmem:[%s1155_s4] sm:$0x3]  ;;  %p808_p4 = pneg %p807_p2  ;;  %p814_p3 = por %p813_p13, %p812_p8 }
  0x77   : > { %625 = vmatpush3.bf16.msra.mxu0 %v624_v23  ;;  %636 = vmatpush1.bf16.msra.mxu1 %v635_v25  ;;  %v381_v49 = vrot.slane %v376_v47, %v380_v46  ;;  %v385_v50 = vrot.slane %v376_v47, %v384_v48 }
  0x78   : > { %626 = vmatprep.subr.bf16.mxu0 %v884_v0  ;;  %638 = vmatprep.subr.bf16.mxu1 %v637_v27  ;;  %p815_p7 = pnand %p814_p3, %p808_p4 }
  0x7b   : > { %628 = vmatpush3.bf16.msra.mxu0 %v627_v30  ;;  %640 = vmatpush1.bf16.msra.mxu1 %v639_v31 }
  0x7c   : > { %642 = vmatprep.subr.bf16.mxu1 %v641_v35 }
  0x7e   : > { %615 = vmatmul.mubr.msk.f32.vlgmr.msra.gmra.mrb[0].mxu0 %vm285_vm1, %v269_v32 }
  0x7f   : > { %644 = vmatpush1.bf16.msra.mxu1 %v643_v38 }
 0x151   : > { %v355_v40 = vpop.f32.mrb[0].mxu0 }
 0x152   : > { %v356_v41 = vadd.f32 %v580_v39, %v355_v40  ;;  %v616_v42 = vpop.f32.mrb[1].mxu0 }
 0x154   : > { %v359_v43 = vmax.f32 %v356_v41, 0.0 }
 0x156   : > { %582 = vmatmul.mubr.msk.f32.vlgmr.msra.gmra.mrb[0].mxu1 %vm285_vm1, %v359_v43 }
 0x229   : > { %v457_v51 = vpop.f32.mrb[0].mxu1 }
 0x22a   : > { %v458_v52 = vadd.f32 %v457_v51, %v381_v49  ;;  %v459_v53 = vpop.f32.mrb[1].mxu1 }
 0x22b   : > { %v460_v54 = vadd.f32 %v459_v53, %v385_v50 }
 0x22c   : > { %462 = vst [vmem:[%s268_s7] sm:$0xff] %v458_v52 }
 0x22d   : > { %463 = vst.msk [vmem:[%s268_s7 + $0x8] sm:$0xff] %vm285_vm1, %v460_v54 }
 0x22e   : > { %818 = shalt.err (!%p815_p7)
}
 0x22f   : > { %s819_s14 = scalar_lea.hbm %s1107_s9, 256  ;;  %s823_s10 = scalar_lea.hbm %s1156_s5, 768 }
 0x230   : > { %p820_p9 = scmp.ne.s32.totalorder %s1107_s9, %s819_s14  ;;  %p824_p0 = scmp.lt.u32.totalorder %s1107_s9, %s1156_s5 }
 0x231   : > { %p825_p10 = scmp.lt.u32.totalorder %s823_s10, %s819_s14  ;;  %p827_p1 = scmp.lt.u32.totalorder %s819_s14, %s1107_s9 }
 0x232   : > { %p821_p12 = pnand %p820_p9, %p1033_p6 }
 0x233   : > { %p826_p11 = por %p825_p10, %p824_p0 }
 0x234   : > { %p822_p5 = pneg %p821_p12 }
 0x235   : > { %p828_p2 = por %p827_p1, %p826_p11 }
 0x237   : > { %p829_p4 = pnand %p828_p2, %p822_p5 }
 0x239   : > { %832 = shalt.err (!%p829_p4)
}
 0x23a   : > { %655 = dma.vmem_to_hbm [thread:$0]  (%p1033_p6), %s1109_s6, 256, %s1107_s9, %s465_s22  }
 0x23b PF: > { %p677_p8 = scmp.ge.s32.totalorder %s875_s21, 2  ;;  %s491_s13 = sand.u32 1, %s863_s18  }
 0x23c   : > { %p1171_p13 = scmp.ne.s32.totalorder %s1161_s25, 0  ;;  %s492_s7 = scalar_lea.sflag [#allocation4], %s491_s13 }
 0x23e   : > { %p669_p3 = pnand %p677_p8, %p1171_p13 }
 0x240   : > { %858 = dma.done.wait (!%p669_p3), %s492_s7, 256  }
 0x241   : > { %860 = vsyncadd (!%p669_p3), %s492_s7, 4294967040  ;;  %p19_p7 = scmp.ge.s32.totalorder %s1020_s16, 5   ;;  %s1172_s18 = smov %s867_s19 }
 0x242   : > { %s1173_s19 = smov %s871_s20  ;;  %s1174_s20 = smov %s1029_s27 }
 0x243   : > { %s1175_s21 = smov %s1020_s16  ;;  %21 = sbr.rel (!%p19_p7) target bundleno = 6 (0x6), region = 93 }
 0x24a   :  { %497 = vsyncpa [#allocation3], 1 }
 0x24b   :  { %499 = vsyncpa [#allocation3 + $0x1], 1 }
 0x24c   :  { %500 = vsyncpa [#allocation6], 1 }
 0x24d   :  { %501 = vsyncpa [#allocation4], 1 }
 0x24e   :  { %503 = vsyncpa [#allocation4 + $0x1], 1 }

</bundles_post_ra>
